<compile_context>
chip_gen: v7x
topology: tpu7x:2x2x1
jax: 0.10.0
libtpu: 0.0.40
codegen_flags: <defaults>
</compile_context>

<pallas_src>
import jax
import jax.numpy as jnp
from jax import lax
from jax.experimental import pallas as pl
from jax.experimental.pallas import tpu as pltpu


def _forward_gradient_kernel(x_ref, halo_ref, out_ref):
    # x_ref:    (1, TH,   W)  current row-tile of the (padded) image
    # halo_ref: (1, HALO, W)  first rows of the NEXT tile (clamped on the last tile)
    # out_ref:  (2, TH,   W)  [0] = d/dW, [1] = d/dH
    i = pl.program_id(0)
    n = pl.num_programs(0)

    x = x_ref[0]                       # (TH, W)
    TH, W = x.shape

    # ---- d/dW: shift left by one lane (XLU), subtract, zero the last column. ----
    gx = jnp.roll(x, shift=-1, axis=1) - x
    col = lax.broadcasted_iota(jnp.int32, (1, W), 1)        # tiny (1, W) mask
    gx = jnp.where(col < W - 1, gx, 0.0)
    out_ref[0] = gx

    # ---- d/dH: shift up by one sublane (XLU), subtract; fix the tile's last row. ----
    gy = jnp.roll(x, shift=-1, axis=0) - x                  # last row = wraparound (wrong)
    halo = halo_ref[0]                                      # (HALO, W)
    seam = halo[0:1, :] - x[TH - 1:TH, :]                   # next tile row 0 - this tile last row
    last_row = jnp.where(i < n - 1, seam, jnp.zeros_like(seam))
    row = lax.broadcasted_iota(jnp.int32, (TH, 1), 0)       # tiny (TH, 1) mask
    gy = jnp.where(row < TH - 1, gy, last_row)
    out_ref[1] = gy                                         # single lane-dense store


def _vmem_plan():
    """Return (tile_budget_bytes, vmem_limit_bytes, min_tiles) for this TPU."""
    try:
        info = pltpu.get_tpu_info()
        vmem = int(getattr(info, "vmem_capacity_bytes", 64 << 20))
    except Exception:
        vmem = 64 << 20  # conservative fallback: assume the smallest per-core VMEM
    if vmem >= (100 << 20):
        # v5e / v6e: 128 MiB VMEM per TensorCore -> bigger tiles, fewer grid steps.
        return 48 << 20, 96 << 20, 1
    # v7x-like: 64 MiB per TC, two TCs share the grid -> keep >=2 tiles when possible.
    return 24 << 20, 40 << 20, 2


def _choose_tile_rows(H, W, itemsize, halo, vmem_budget_bytes, min_tiles):
    """Largest row-tile (multiple of `halo`, dividing H) whose working set fits the
    budget: double-buffered input (1 ch) + output (2 ch) blocks, the double-buffered
    halo block, and ~3 channels of f32 compiler temporaries (roll/gx/gy slabs)."""
    bytes_per_row = (2 * 1 + 2 * 2) * W * itemsize + 3 * W * 4
    halo_bytes = 2 * halo * W * itemsize
    budget = max(vmem_budget_bytes - halo_bytes, halo * bytes_per_row)
    cap = max(halo, (budget // bytes_per_row) // halo * halo)
    if min_tiles > 1 and H >= min_tiles * halo:
        cap = min(cap, max(halo, (H // min_tiles) // halo * halo))
    th = max(halo, (min(H, cap) // halo) * halo)
    while th > halo and H % th != 0:
        th -= halo
    return th if H % th == 0 else H


def forward_gradient(x, *, tile_rows=None):
    """x: (1, H, W) -> (2, H, W) forward differences with zero border (float32 spec)."""
    assert x.ndim == 3 and x.shape[0] == 1
    _, H, W = x.shape
    itemsize = jnp.dtype(x.dtype).itemsize
    halo = max(8, 32 // itemsize)      # min sublane tile for this dtype (8 for f32)

    # Edge-pad H to a multiple of the sublane tile and W to a multiple of 128.
    # Edge padding makes the forward difference at the true border exactly zero,
    # so slicing the padded result reproduces the reference semantics bit-exactly.
    H_pad = -(-H // halo) * halo
    W_pad = -(-W // 128) * 128
    padded = (H_pad, W_pad) != (H, W)
    xp = jnp.pad(x, ((0, 0), (0, H_pad - H), (0, W_pad - W)), mode="edge") if padded else x

    budget, vmem_limit, min_tiles = _vmem_plan()
    if tile_rows is not None:
        TH = tile_rows
        assert H_pad % TH == 0, "tile_rows must divide the padded height"
        assert TH % halo == 0, f"tile_rows must be a multiple of {halo}"
    else:
        TH = _choose_tile_rows(H_pad, W_pad, itemsize, halo, budget, min_tiles)

    n_tiles = H_pad // TH
    halo_stride = TH // halo                 # blocks of `halo` rows per tile
    last_halo_block = H_pad // halo - 1

    def x_map(i):
        return (0, i, 0)

    def halo_map(i):
        # First `halo` rows of the *next* tile; clamp on the last tile (value unused).
        return (0, jnp.minimum((i + 1) * halo_stride, last_halo_block), 0)

    def out_map(i):
        return (0, i, 0)

    out = pl.pallas_call(
        _forward_gradient_kernel,
        out_shape=jax.ShapeDtypeStruct((2, H_pad, W_pad), x.dtype),
        grid=(n_tiles,),
        in_specs=[
            pl.BlockSpec((1, TH, W_pad), x_map),
            pl.BlockSpec((1, halo, W_pad), halo_map),
        ],
        out_specs=pl.BlockSpec((2, TH, W_pad), out_map),
        compiler_params=pltpu.CompilerParams(
            dimension_semantics=("parallel",),   # independent tiles -> megacore sharding
            vmem_limit_bytes=vmem_limit,
        ),
    )(xp, xp)

    if padded:
        out = out[:, :H, :W]
    return out


def _forward_gradient_ref(x):
    """Pure-JAX reference mirroring the PyTorch module exactly."""
    _, H, W = x.shape
    g = jnp.zeros((2, H, W), x.dtype)
    g = g.at[0, :, :-1].set(x[0, :, 1:] - x[0, :, :-1])
    g = g.at[1, :-1, :].set(x[0, 1:, :] - x[0, :-1, :])
    return g


if __name__ == "__main__":
    key = jax.random.PRNGKey(0)
    k1, k2, k3 = jax.random.split(key, 3)

    ok = True

    # Multi-tile case: exercises the seam halo between row tiles.
    x1 = jax.random.normal(k1, (1, 64, 256), dtype=jnp.float32)
    out1 = jax.block_until_ready(forward_gradient(x1, tile_rows=16))
    ok &= bool(jnp.allclose(out1, _forward_gradient_ref(x1), atol=1e-6, rtol=1e-6))

    # Auto-tiling at the original test shape (may split into >=2 tiles on v7x).
    x2 = jax.random.normal(k2, (1, 16, 128), dtype=jnp.float32)
    out2 = jax.block_until_ready(forward_gradient(x2))
    ok &= bool(jnp.allclose(out2, _forward_gradient_ref(x2), atol=1e-6, rtol=1e-6))

    # Unaligned H (not multiple of 8) and W (not multiple of 128) -> edge-pad + slice path.
    x3 = jax.random.normal(k3, (1, 12, 200), dtype=jnp.float32)
    out3 = jax.block_until_ready(forward_gradient(x3))
    ok &= bool(jnp.allclose(out3, _forward_gradient_ref(x3), atol=1e-6, rtol=1e-6))

    assert ok, "mismatch vs reference"
    print("KERNEL_OK")
</pallas_src>

<mosaic_0001>
module attributes {stable_mosaic.version = 11 : i64} {
  func.func @_forward_gradient_kernel(%arg0: i32, %arg1: memref<1x16x256xf32, #tpu.memory_space<vmem>>, %arg2: memref<1x8x256xf32, #tpu.memory_space<vmem>>, %arg3: memref<2x16x256xf32, #tpu.memory_space<vmem>>) attributes {dimension_semantics = [#tpu.dimension_semantics<parallel>], iteration_bounds = array<i64: 4>, scalar_prefetch = 0 : i64, scratch_operands = 0 : i64, tpu.core_type = #tpu.core_type<tc>, window_params = [{transform_indices = @transform_0, window_bounds = array<i64: 1, 16, 256>}, {transform_indices = @transform_1, window_bounds = array<i64: 1, 8, 256>}, {transform_indices = @transform_2, window_bounds = array<i64: 2, 16, 256>}]} {
    %c0 = arith.constant 0 : index
    %c0_0 = arith.constant 0 : index
    %c0_1 = arith.constant 0 : index
    %0 = vector.load %arg1[%c0, %c0_0, %c0_1] : memref<1x16x256xf32, #tpu.memory_space<vmem>>, vector<1x16x256xf32>
    %1 = vector.shape_cast %0 : vector<1x16x256xf32> to vector<16x256xf32>
    %2 = vector.extract_strided_slice %1 {offsets = [0, 1], sizes = [16, 255], strides = [1, 1]} : vector<16x256xf32> to vector<16x255xf32>
    %3 = vector.extract_strided_slice %1 {offsets = [0, 0], sizes = [16, 1], strides = [1, 1]} : vector<16x256xf32> to vector<16x1xf32>
    %4 = tpu.concatenate %2, %3 in 1 : vector<16x255xf32>, vector<16x1xf32> -> vector<16x256xf32>
    %5 = arith.subf %4, %1 : vector<16x256xf32>
    %6 = tpu.iota {dimensions = array<i32: 1>} : vector<1x256xi32>
    %c255_i32 = arith.constant 255 : i32
    %7 = vector.broadcast %c255_i32 : i32 to vector<1x256xi32>
    %8 = arith.cmpi slt, %6, %7 : vector<1x256xi32>
    %cst = arith.constant 0.000000e+00 : f32
    %9 = vector.shape_cast %8 : vector<1x256xi1> to vector<1x256xi1>
    %10 = vector.broadcast %9 : vector<1x256xi1> to vector<16x256xi1>
    %11 = vector.broadcast %cst : f32 to vector<16x256xf32>
    %12 = arith.select %10, %5, %11 : vector<16x256xi1>, vector<16x256xf32>
    %c0_2 = arith.constant 0 : index
    %c0_3 = arith.constant 0 : index
    %c0_4 = arith.constant 0 : index
    %13 = vector.load %arg3[%c0_2, %c0_3, %c0_4] : memref<2x16x256xf32, #tpu.memory_space<vmem>>, vector<1x16x256xf32>
    %14 = vector.shape_cast %13 : vector<1x16x256xf32> to vector<16x256xf32>
    %15 = vector.shape_cast %12 : vector<16x256xf32> to vector<1x16x256xf32>
    tpu.vector_store %arg3[%c0_2, %c0_3, %c0_4], %15 {strides = array<i32>} : memref<2x16x256xf32, #tpu.memory_space<vmem>>, vector<1x16x256xf32>,
    %16 = vector.extract_strided_slice %1 {offsets = [1, 0], sizes = [15, 256], strides = [1, 1]} : vector<16x256xf32> to vector<15x256xf32>
    %17 = vector.extract_strided_slice %1 {offsets = [0, 0], sizes = [1, 256], strides = [1, 1]} : vector<16x256xf32> to vector<1x256xf32>
    %18 = tpu.concatenate %16, %17 in 0 : vector<15x256xf32>, vector<1x256xf32> -> vector<16x256xf32>
    %19 = arith.subf %18, %1 : vector<16x256xf32>
    %c0_5 = arith.constant 0 : index
    %c0_6 = arith.constant 0 : index
    %c0_7 = arith.constant 0 : index
    %20 = vector.load %arg2[%c0_5, %c0_6, %c0_7] : memref<1x8x256xf32, #tpu.memory_space<vmem>>, vector<1x8x256xf32>
    %21 = vector.shape_cast %20 : vector<1x8x256xf32> to vector<8x256xf32>
    %22 = vector.extract_strided_slice %21 {offsets = [0, 0], sizes = [1, 256], strides = [1, 1]} : vector<8x256xf32> to vector<1x256xf32>
    %23 = vector.extract_strided_slice %1 {offsets = [15, 0], sizes = [1, 256], strides = [1, 1]} : vector<16x256xf32> to vector<1x256xf32>
    %24 = arith.subf %22, %23 : vector<1x256xf32>
    %c3_i32 = arith.constant 3 : i32
    %25 = arith.cmpi slt, %arg0, %c3_i32 : i32
    %cst_8 = arith.constant 0.000000e+00 : f32
    %26 = vector.broadcast %cst_8 : f32 to vector<1x256xf32>
    %27 = arith.select %25, %24, %26 : vector<1x256xf32>
    %28 = tpu.iota {dimensions = array<i32: 0>} : vector<16x1xi32>
    %c15_i32 = arith.constant 15 : i32
    %29 = vector.broadcast %c15_i32 : i32 to vector<16x1xi32>
    %30 = arith.cmpi slt, %28, %29 : vector<16x1xi32>
    %31 = vector.shape_cast %30 : vector<16x1xi1> to vector<16x1xi1>
    %32 = vector.broadcast %31 : vector<16x1xi1> to vector<16x256xi1>
    %33 = vector.shape_cast %27 : vector<1x256xf32> to vector<1x256xf32>
    %34 = vector.broadcast %33 : vector<1x256xf32> to vector<16x256xf32>
    %35 = arith.select %32, %19, %34 : vector<16x256xi1>, vector<16x256xf32>
    %c1 = arith.constant 1 : index
    %c0_9 = arith.constant 0 : index
    %c0_10 = arith.constant 0 : index
    %36 = vector.load %arg3[%c1, %c0_9, %c0_10] : memref<2x16x256xf32, #tpu.memory_space<vmem>>, vector<1x16x256xf32>
    %37 = vector.shape_cast %36 : vector<1x16x256xf32> to vector<16x256xf32>
    %38 = vector.shape_cast %35 : vector<16x256xf32> to vector<1x16x256xf32>
    tpu.vector_store %arg3[%c1, %c0_9, %c0_10], %38 {strides = array<i32>} : memref<2x16x256xf32, #tpu.memory_space<vmem>>, vector<1x16x256xf32>,
    return
  }
  func.func @transform_0(%arg0: i32) -> (i32, i32, i32) {
    %c0_i32 = arith.constant 0 : i32
    %c0_i32_0 = arith.constant 0 : i32
    %c0_i32_1 = arith.constant 0 : i32
    return %c0_i32, %arg0, %c0_i32_0 : i32, i32, i32
  }
  func.func @transform_1(%arg0: i32) -> (i32, i32, i32) {
    %c1_i32 = arith.constant 1 : i32
    %0 = arith.addi %arg0, %c1_i32 : i32
    %c2_i32 = arith.constant 2 : i32
    %1 = arith.muli %0, %c2_i32 : i32
    %c7_i32 = arith.constant 7 : i32
    %2 = arith.minsi %1, %c7_i32 : i32
    %c0_i32 = arith.constant 0 : i32
    %c0_i32_0 = arith.constant 0 : i32
    %c0_i32_1 = arith.constant 0 : i32
    return %c0_i32, %2, %c0_i32_0 : i32, i32, i32
  }
  func.func @transform_2(%arg0: i32) -> (i32, i32, i32) {
    %c0_i32 = arith.constant 0 : i32
    %c0_i32_0 = arith.constant 0 : i32
    %c0_i32_1 = arith.constant 0 : i32
    return %c0_i32, %arg0, %c0_i32_0 : i32, i32, i32
  }
}

</mosaic_0001>

<bundles_post_ra>
// kernel: tpu_custom_call.1
= control target key start
LH: loop header
LB: loop body
LE: loop exit
PB: predicated region body
PF: predicated region fallthrough
CT: control target
= control target key end

     0   :  { %7 = vsyncpa [#allocation3], 0  ;;  %s1029_s0 = inlined_call_operand.hbm [shape: f32[1,64,256], index: 0, kind: input, shape index: {}]   ;;  %s1030_s1 = inlined_call_operand.hbm [shape: f32[1,64,256], index: 1, kind: input, shape index: {}]   ;;  %s1031_s2 = inlined_call_operand.hbm [shape: f32[2,64,256], index: 2, kind: output, shape index: {}]  }
   0x1   :  { %9 = vsyncpa [#allocation3 + $0x1], 0 }
   0x2   :  { %10 = vsyncpa [#allocation6], 0 }
   0x3   :  { %12 = vsyncpa [#allocation6 + $0x1], 0 }
   0x4   :  { %13 = vsyncpa [#allocation4], 0 }
   0x5   :  { %15 = vsyncpa [#allocation4 + $0x1], 0  ;;  %s752_s9 = smov 0   ;;  %s754_s10 = smov 0  }
   0x6   :  { %s756_s11 = smov 0   ;;  %s758_s12 = smov 0  }
   0x7   :  { %s760_s13 = smov 0   ;;  %s762_s14 = smov 0  }
   0x8   :  { %s764_s15 = smov 0  }
   0x9 LB: > { %s466_s16 = sadd.s32 4294967294, %s723_s15   ;;  %s789_s17 = sadd.s32 1, %s723_s15   ;;  %s723_s15 = sphi %s764_s15, %s1063_s15   ;;  %s719_s14 = sphi %s762_s14, %s1062_s14   ;;  %s715_s13 = sphi %s760_s13, %s1061_s13   ;;  %s711_s12 = sphi %s758_s12, %s1060_s12   ;;  %s707_s11 = sphi %s756_s11, %s1059_s11   ;;  %s703_s10 = sphi %s754_s10, %s1058_s10   ;;  %s699_s9 = sphi %s752_s9, %s1057_s9  }
   0xa   : > { %s25_s18 = ssub.s32 %s723_s15, %s789_s17  ;;  %s28_s19 = sadd.s32 1, %s719_s14 }
   0xb   : > { %p26_p0 = scmp.eq.s32.totalorder %s25_s18, 0  ;;  %p1033_p1 = scmp.ne.s32.totalorder %s719_s14, %s715_s13 }
   0xc   : > { %p1034_p2 = scmp.eq.s32.totalorder %s723_s15, 0  ;;  %p1035_p3 = scmp.ne.s32.totalorder %s715_s13, %s711_s12 }
   0xd   : > { %s800_s20 = scalar_select %p26_p0, %s719_s14, %s28_s19  }
   0xe   : > { %p37_p4 = por %p1034_p2, %p1033_p1  ;;  %p105_p5 = scmp.eq.s32.totalorder %s466_s16, 3 }
   0xf   : > { %p1032_p6 = scmp.lt.s32.totalorder %s723_s15, 4  ;;  %s125_s22 = sand.u32 1, %s719_s14  }
  0x10   : > { %p811_p7 = por %p105_p5, %p1035_p3  ;;  %s471_s23 = sshll.u32 %s125_s22, 5 }
  0x11   : > { %s498_s24 = sshll.u32 %s723_s15, 9  ;;  %s129_s28 = scalar_lea.vmem [#allocation2], %s471_s23 }
  0x12   : > { %s1039_s21 = scalar_select %p811_p7, 1, 0 }
  0x13   : > { %s820_s27 = scalar_lea.hbm %s1029_s0, %s498_s24  ;;  %s137_s29 = sshll.u32 %s129_s28, 4  ;;  %s822_s29 = int_to_ptr.vmem [resolvable:$true] %s137_s29 }
  0x14   : > { %p826_p8 = pnand %p1032_p6, %p37_p4  ;;  %s831_s3 = scalar_lea.sflag [#allocation3], %s125_s22 }
  0x15   : > { %s597_s4 = scalar_lea.hbm %s820_s27, 512  ;;  %s602_s7 = scalar_lea.hbm %s1029_s0, 2048 }
  0x16   : > { %p598_p10 = scmp.ne.s32.totalorder %s820_s27, %s597_s4  ;;  %p599_p11 = pneg %p826_p8 }
  0x17   : > { %p603_p0 = scmp.lt.u32.totalorder %s820_s27, %s1029_s0  ;;  %p604_p4 = scmp.lt.u32.totalorder %s602_s7, %s597_s4 }
  0x18   : > { %p600_p12 = pnand %p599_p11, %p598_p10  ;;  %p606_p6 = scmp.lt.u32.totalorder %s597_s4, %s820_s27 }
  0x19   : > { %p605_p5 = por %p604_p4, %p603_p0 }
  0x1a   : > { %p601_p13 = pneg %p600_p12 }
  0x1b   : > { %p607_p1 = por %p606_p6, %p605_p5 }
  0x1d   : > { %p608_p2 = pnand %p607_p1, %p601_p13 }
  0x1f   : > { %611 = shalt.err (!%p608_p2)
}
  0x20   : > { %s612_s18 = scalar_lea.vmem %s822_s29, 512  ;;  %s725_s19 = smov [#allocation2]  }
  0x21   : > { %p613_p10 = scmp.ne.s32.totalorder %s822_s29, %s612_s18  ;;  %s617_s22 = sshll.u32 %s725_s19, 4  ;;  %s618_s22 = int_to_ptr.vmem [resolvable:$false] %s617_s22 }
  0x22   : > { %s619_s23 = scalar_lea.vmem %s618_s22, 1024  ;;  %p620_p9 = scmp.lt.s32.totalorder %s822_s29, %s618_s22 }
  0x23   : > { %p615_p12 = pnand %p613_p10, %p599_p11  ;;  %p621_p0 = scmp.lt.s32.totalorder %s619_s23, %s612_s18 }
  0x25   : > { %p616_p3 = pneg %p615_p12  ;;  %p622_p4 = por %p621_p0, %p620_p9 }
  0x27   : > { %p623_p6 = pnand %p622_p4, %p616_p3 }
  0x29   : > { %626 = shalt.err (!%p623_p6)
}
  0x2a   : > { %s726_s24 = smov 256   ;;  %s727_s25 = smov 16  }
  0x2b   : > { %521 = dma.hbm_to_vmem [thread:$0]  (!%p826_p8), %s820_s27, 512, %s822_s29, %s831_s3, %s726_s24, %s726_s24, %s727_s25  }
  0x2c   : > { %p168_p1 = scmp.lt.s32.totalorder %s723_s15, 5  ;;  %p1041_p2 = scmp.ge.s32.totalorder %s723_s15, 1 }
  0x2d   : > { %s867_s28 = sadd.s32 4294967295, %s723_s15   ;;  %s493_s4 = sshll.u32 %s723_s15, 1 }
  0x2e   : > { %p862_p3 = pnand %p1041_p2, %p168_p1  ;;  %p42_p9 = scmp.eq.s32.totalorder %s867_s28, 0 }
  0x2f   : > { %s494_s30 = sadd.s32 2, %s493_s4  ;;  %p1043_p11 = scmp.ne.s32.totalorder %s715_s13, %s711_s12 }
  0x30   : > { %p53_p8 = scmp.lt.s32.totalorder %s494_s30, 7  ;;  %s496_s27 = sadd.s32 2, %s494_s30 }
  0x31   : > { %p876_p13 = por %p42_p9, %p1043_p11  ;;  %p57_p5 = scmp.lt.s32.totalorder %s496_s27, 7 }
  0x32   : > { %s1065_s30 = smov (!%p53_p8, %s494_s30), 7  ;;  %s62_s3 = sadd.s32 1, %s707_s11 }
  0x33   : > { %s1044_s29 = scalar_select %p876_p13, 1, 0 }
  0x34   : > { %s1067_s27 = smov (!%p57_p5, %s496_s27), 7  ;;  %p69_p10 = scmp.ne.s32.totalorder %s707_s11, %s703_s10 }
  0x35   : > { %s59_s5 = ssub.s32 %s1065_s30, %s1067_s27  ;;  %p75_p12 = scmp.ne.s32.totalorder %s703_s10, %s699_s9 }
  0x36   : > { %p60_p0 = scmp.eq.s32.totalorder %s59_s5, 0  ;;  %p1045_p4 = scmp.eq.s32.totalorder %s723_s15, 0 }
  0x37   : > { %p889_p1 = por %p75_p12, %p42_p9  ;;  %p99_p2 = scmp.eq.s32.totalorder %s867_s28, 3 }
  0x38   : > { %p71_p6 = por %p69_p10, %p1045_p4  ;;  %p1047_p11 = scmp.ne.s32.totalorder %s719_s14, %s715_s13 }
  0x39   : > { %s1046_s6 = scalar_select %p889_p1, 1, 0 }
  0x3a   : > { %s895_s7 = scalar_select %p60_p0, %s707_s11, %s62_s3  }
  0x3b   : > { %p900_p7 = por %p99_p2, %p1047_p11  ;;  %s147_s16 = sand.u32 1, %s707_s11  }
  0x3c   : > { %s475_s18 = sshll.u32 %s147_s16, 4  ;;  %s501_s19 = sshll.u32 %s1065_s30, 8 }
  0x3d   : > { %s1048_s8 = scalar_select %p900_p7, 1, 0 }
  0x3e   : > { %s908_s23 = scalar_lea.hbm %s1030_s1, %s501_s19  ;;  %s151_s24 = scalar_lea.vmem [#allocation5], %s475_s18 }
  0x3f   : > { %s163_s25 = sshll.u32 %s151_s24, 4  ;;  %p1049_p9 = scmp.lt.s32.totalorder %s723_s15, 4  ;;  %s910_s25 = int_to_ptr.vmem [resolvable:$true] %s163_s25 }
  0x40   : > { %s148_s30 = scalar_lea.sflag [#allocation6], %s147_s16  ;;  %s627_s27 = scalar_lea.hbm %s908_s23, 256 }
  0x41   : > { %p914_p8 = pnand %p1049_p9, %p71_p6  ;;  %p628_p5 = scmp.ne.s32.totalorder %s908_s23, %s627_s27 }
  0x42   : > { %s632_s18 = scalar_lea.hbm %s1030_s1, 2048  ;;  %p633_p4 = scmp.lt.u32.totalorder %s908_s23, %s1030_s1 }
  0x43   : > { %p629_p10 = pneg %p914_p8  ;;  %p634_p6 = scmp.lt.u32.totalorder %s632_s18, %s627_s27 }
  0x44   : > { %p636_p11 = scmp.lt.u32.totalorder %s627_s27, %s908_s23 }
  0x45   : > { %p630_p12 = pnand %p629_p10, %p628_p5  ;;  %p635_p2 = por %p634_p6, %p633_p4 }
  0x47   : > { %p631_p0 = pneg %p630_p12  ;;  %p637_p9 = por %p636_p11, %p635_p2 }
  0x49   : > { %p638_p7 = pnand %p637_p9, %p631_p0 }
  0x4b   : > { %641 = shalt.err (!%p638_p7)
}
  0x4c   : > { %s642_s16 = scalar_lea.vmem %s910_s25, 256  ;;  %s728_s22 = smov [#allocation5]  }
  0x4d   : > { %p643_p5 = scmp.ne.s32.totalorder %s910_s25, %s642_s16  ;;  %s647_s24 = sshll.u32 %s728_s22, 4  ;;  %s648_s24 = int_to_ptr.vmem [resolvable:$false] %s647_s24 }
  0x4e   : > { %s649_s3 = scalar_lea.vmem %s648_s24, 512  ;;  %p650_p13 = scmp.lt.s32.totalorder %s910_s25, %s648_s24 }
  0x4f   : > { %p645_p12 = pnand %p643_p5, %p629_p10  ;;  %p651_p4 = scmp.lt.s32.totalorder %s649_s3, %s642_s16 }
  0x51   : > { %p646_p1 = pneg %p645_p12  ;;  %p652_p6 = por %p651_p4, %p650_p13 }
  0x53   : > { %p653_p2 = pnand %p652_p6, %p646_p1 }
  0x55   : > { %656 = shalt.err (!%p653_p2)
}
  0x56   : > { %524 = dma.hbm_to_vmem [thread:$0]  (!%p914_p8), %s908_s23, 256, %s910_s25, %s148_s30  }
  0x57   : > { %172 = sbr.rel (%p862_p3) target bundleno = 236 (0xec), region = 28  ;;  %s946_s27 = sand.u32 (!%p862_p3), 1, %s715_s13  }
  0x58   : > { %s480_s5 = sshll.u32 (!%p862_p3), %s946_s27, 5  ;;  %s175_s18 = scalar_lea.sflag (!%p862_p3), [#allocation3], %s946_s27 }
  0x59   : > { %s178_s19 = scalar_lea.vmem (!%p862_p3), [#allocation2], %s480_s5  ;;  %p1051_p7 = scmp.ne.s32.totalorder (!%p862_p3), %s1044_s29, 0 }
  0x5e   : > { %686 = dma.done.wait (%p1051_p7), %s175_s18, 512  }
  0x5f   : > { %688 = vsyncadd (%p1051_p7), %s175_s18, 4294966784  ;;  %s183_s23 = sand.u32 1, %s703_s10   ;;  %p1052_p3 = scmp.ne.s32.totalorder %s1046_s6, 0 }
  0x60   : > { %s481_s25 = sshll.u32 %s183_s23, 4  ;;  %s184_s26 = scalar_lea.sflag [#allocation6], %s183_s23 }
  0x61   : > { %s187_s4 = scalar_lea.vmem [#allocation5], %s481_s25 }
  0x62   : > { %690 = dma.done.wait (%p1052_p3), %s184_s26, 256  }
  0x63   : > { %692 = vsyncadd (%p1052_p3), %s184_s26, 4294967040  ;;  %v250_v0 = vlaneseq  ;;  %p294_p13 = scmp.lt.s32.totalorder %s867_s28, 3  ;;  %v221_v3 = vld [vmem:[%s178_s19 + $0x10] sm:$0xff]  ;;  %s482_s29 = sshll.u32 %s946_s27, 6  ;;  %v219_v5 = vld [vmem:[%s178_s19] sm:$0xff]  ;;  %vm267_vm0 = vcmask 1046528  }
  0x64   : > { %v286_v4 = vld [vmem:[%s187_s4] sm:$0xff]  ;;  %s729_s9 = smov 127   ;;  %v269_v6 = vrot.slane %v221_v3, 1  ;;  %v288_v7 = vrot.slane %v221_v3, 7  ;;  %v268_v8 = vrot.slane %v219_v5, 1  ;;  %v222_v9 = vld [vmem:[%s178_s19 + $0x18] sm:$0xff] }
  0x65   : > { %s295_s30 = scalar_select %p294_p13, 1, 0  ;;  %v301_v1 = vshrl.u32 %v250_v0, 7  ;;  %231 = vrot.lane.b32.xlu1 %v221_v3, %s729_s9  ;;  %227 = vrot.lane.b32.xlu0 %v219_v5, %s729_s9  ;;  %v287_v10 = vld [vmem:[%s187_s4 + $0x8] sm:$0xff]  ;;  %v272_v12 = vrot.slane %v222_v9, 1  ;;  %v289_v13 = vrot.slane %v222_v9, 7 }
  0x66   : > { %v220_v14 = vld [vmem:[%s178_s19 + $0x8] sm:$0xff]  ;;  %v292_v17 = vsub.f32 %v286_v4, %v288_v7  ;;  %v270_v18 = vsel %vm267_vm0, %v268_v8, %v269_v6  ;;  %v280_v19 = vsel %vm267_vm0, %v269_v6, %v268_v8  ;;  %s971_s6 = scalar_lea.vmem [#allocation7], %s482_s29  ;;  %v251_v34 = vand.u32 127, %v250_v0  ;;  %s327_s16 = scalar_lea.sflag [#allocation4], %s946_s27 }
  0x67   : > { %v296_v2 = vstv %s295_s30  ;;  %v302_v11 = vadd.s32 8, %v301_v1  ;;  %v311_v16 = vsub.s32 0, %v301_v1  ;;  %v271_v20 = vrot.slane %v220_v14, 1 }
  0x68   : > { %vm961_vm1 = vcmp.eq.s32.totalorder %v296_v2, 1  ;;  %v282_v21 = vsub.f32 %v270_v18, %v219_v5  ;;  %v284_v22 = vsub.f32 %v280_v19, %v221_v3  ;;  %v293_v23 = vsub.f32 %v287_v10, %v289_v13 }
  0x69   : > { %233 = vrot.lane.b32.xlu1 %v222_v9, %s729_s9  ;;  %v273_v24 = vsel %vm267_vm0, %v271_v20, %v272_v12  ;;  %v281_v25 = vsel %vm267_vm0, %v272_v12, %v271_v20  ;;  %229 = vrot.lane.b32.xlu0 %v220_v14, %s729_s9  ;;  %vm304_vm2 = vcmp.lt.s32.totalorder %v302_v11, 15  ;;  %v298_v26 = vsel %vm961_vm1, %v292_v17, 0.0 }
  0x6a   : > { %483 = vst [vmem:[%s971_s6 + $0x20] sm:$0xff] %v282_v21  ;;  %v283_v27 = vsub.f32 %v273_v24, %v220_v14  ;;  %v285_v28 = vsub.f32 %v281_v25, %v222_v9  ;;  %v299_v29 = vsel %vm961_vm1, %v293_v23, 0.0  ;;  %v312_v30 = vrot.slane %v298_v26, %v311_v16 }
  0x6b   : > { %v316_v31 = vrot.slane %v299_v29, %v311_v16  ;;  %v252_v37 = vadd.s32 128, %v251_v34  ;;  %vm235_vm3 = vcmask 1039360  }
  0x6c   : > { %484 = vst [vmem:[%s971_s6 + $0x28] sm:$0xff] %v283_v27  ;;  %v319_v32 = vsel %vm304_vm2, %v284_v22, %v312_v30 }
  0x6d   : > { %v320_v33 = vsel %vm304_vm2, %v285_v28, %v316_v31  ;;  %485 = vst [vmem:[%s971_s6 + $0x30] sm:$0xff] %v319_v32  ;;  %vm254_vm4 = vcmp.lt.s32.totalorder %v252_v37, 255 }
  0x6e   : > { %486 = vst [vmem:[%s971_s6 + $0x38] sm:$0xff] %v320_v33 }
  0xd7   : > { %v232_v35 = vpop.permute.xlu1 %231  ;;  %v228_v36 = vpop.permute.xlu0 %227 }
  0xdb   : > { %v234_v38 = vpop.permute.xlu1 %233  ;;  %v230_v39 = vpop.permute.xlu0 %229 }
  0xdc   : > { %v237_v40 = vsel %vm235_vm3, %v232_v35, %v234_v38  ;;  %v245_v41 = vsel %vm235_vm3, %v234_v38, %v232_v35  ;;  %v236_v42 = vsel %vm235_vm3, %v228_v36, %v230_v39  ;;  %v244_v43 = vsel %vm235_vm3, %v230_v39, %v228_v36 }
  0xdd   : > { %v248_v44 = vsub.f32 %v237_v40, %v221_v3  ;;  %v249_v45 = vsub.f32 %v245_v41, %v222_v9  ;;  %v246_v46 = vsub.f32 %v236_v42, %v219_v5  ;;  %v247_v47 = vsub.f32 %v244_v43, %v220_v14 }
  0xdf   : > { %v262_v48 = vsel %vm254_vm4, %v249_v45, 0.0  ;;  %265 = vst [vmem:[%s971_s6 + $0x10] sm:$0xff] %v248_v44  ;;  %v260_v49 = vsel %vm254_vm4, %v247_v47, 0.0  ;;  %263 = vst [vmem:[%s971_s6] sm:$0xff] %v246_v46 }
  0xe0   : > { %266 = vst [vmem:[%s971_s6 + $0x18] sm:$0xff] %v262_v48  ;;  %264 = vst [vmem:[%s971_s6 + $0x8] sm:$0xff] %v260_v49 }
  0xe1   : > { %s503_s22 = sshll.u32 %s867_s28, 9  ;;  %s357_s24 = sshll.u32 %s971_s6, 4  ;;  %s358_s24 = int_to_ptr.vmem [resolvable:$true] %s357_s24 }
  0xe2   : > { %s340_s18 = scalar_lea.hbm %s1031_s2, %s503_s22  ;;  %s730_s19 = smov 512  }
  0xe3   : > { %p1055_p1 = scmp.ne.s32.totalorder %s1048_s8, 0  ;;  %s731_s27 = smov 2048  }
  0xe4   : > { %s732_s23 = smov 2   ;;  %s733_s25 = smov 256  }
  0xe5   : > { %510 = sst [smem:[#allocation9]] (%p1055_p1), %s730_s19  ;;  %s734_s28 = smov 16  }
  0xe6   : > { %511 = sst [smem:[#allocation9 + $0x1]] (%p1055_p1), %s731_s27  ;;  %s735_s26 = smov [#allocation8]  }
  0xe7   : > { %512 = sst [smem:[#allocation9 + $0x2]] (%p1055_p1), %s732_s23  ;;  %s736_s4 = smov 0  }
  0xe8   : > { %513 = sst [smem:[#allocation9 + $0x3]] (%p1055_p1), %s733_s25 }
  0xe9   : > { %514 = sst [smem:[#allocation9 + $0x4]] (%p1055_p1), %s733_s25 }
  0xea   : > { %515 = sst [smem:[#allocation9 + $0x5]] (%p1055_p1), %s734_s28 }
  0xeb   : > { %516 = dma.general (%p1055_p1), %s358_s24, 1024, %s340_s18, %s327_s16, %s735_s26, [#allocation9], %s736_s4, 0  }
  0xec PF: > { %p530_p8 = scmp.ge.s32.totalorder %s723_s15, 2  ;;  %s385_s30 = sand.u32 1, %s711_s12  }
  0xed   : > { %p1056_p10 = scmp.ne.s32.totalorder %s1039_s21, 0  ;;  %s386_s29 = scalar_lea.sflag [#allocation4], %s385_s30 }
  0xef   : > { %p526_p0 = pnand %p530_p8, %p1056_p10 }
  0xf1   : > { %694 = dma.done.wait (!%p526_p0), %s386_s29, 1024  }
  0xf2   : > { %696 = vsyncadd (!%p526_p0), %s386_s29, 4294966272  ;;  %p18_p11 = scmp.ge.s32.totalorder %s789_s17, 6   ;;  %s1057_s9 = smov %s703_s10 }
  0xf3   : > { %s1058_s10 = smov %s707_s11  ;;  %s1059_s11 = smov %s895_s7 }
  0xf4   : > { %s1060_s12 = smov %s715_s13  ;;  %s1061_s13 = smov %s719_s14 }
  0xf5   : > { %s1062_s14 = smov %s800_s20  ;;  %s1063_s15 = smov %s789_s17 }
  0xf6   :  { %20 = sbr.rel (!%p18_p11) target bundleno = 9 (0x9), region = 92 }
  0xfd   :  { %391 = vsyncpa [#allocation3], 1 }
  0xfe   :  { %393 = vsyncpa [#allocation3 + $0x1], 1 }
  0xff   :  { %394 = vsyncpa [#allocation6], 1 }
 0x100   :  { %396 = vsyncpa [#allocation6 + $0x1], 1 }
 0x101   :  { %397 = vsyncpa [#allocation4], 1 }
 0x102   :  { %399 = vsyncpa [#allocation4 + $0x1], 1 }

</bundles_post_ra>
